<compile_context>
chip_gen: v7x
topology: tpu7x:2x2x1
jax: 0.10.0
libtpu: 0.0.40
codegen_flags: <defaults>
</compile_context>

<pallas_src>
import functools

import jax
import jax.numpy as jnp
from jax.experimental import pallas as pl
from jax.experimental.pallas import tpu as pltpu


def _gather_einsum_kernel(E, K, J, ind_ref, x_ref, w_ref, o_ref):
    # ind_ref: SMEM (B, E*K) int32   — scalar-prefetched token indices
    # x_ref:   VMEM (T, 1)   float32 — feature-0 column of X[b] (T on sublanes)
    # w_ref:   VMEM (E, J)   float32 — w_sum = sum_i W[e, i, :], resident across grid
    # o_ref:   VMEM (E*K, J) float32 — Y[b] flattened over (e, k)
    b = pl.program_id(0)
    # E and K are small compile-time constants here, so a static unrolled loop is
    # cheapest; only the token index `t` is dynamic.  For very large E*K this
    # would become a lax.fori_loop(..., unroll=True) to bound code size.
    for e in range(E):
        w_row = w_ref[e:e + 1, :]                 # (1, J), static slice
        for k in range(K):
            r = e * K + k
            t = ind_ref[b, r]                     # scalar token index from SMEM
            xval = x_ref[pl.ds(t, 1), :]          # (1, 1): X[b, t, 0]
            o_ref[r:r + 1, :] = xval * w_row      # (1, J) VPU outer-product row


def gather_einsum(X, ind, W):
    B, T, I = X.shape
    _, E, K = ind.shape
    E2, I2, J = W.shape
    assert E == E2 and I == I2

    # Only feature 0 of X is ever read (gather index not expanded over I), and the
    # size-1 'i' broadcast means W only enters through its sum over i.
    x0 = X[:, :, 0:1].astype(jnp.float32)                 # (B, T, 1)
    w_sum = jnp.sum(W, axis=1).astype(jnp.float32)        # (E, J)
    ind_flat = ind.reshape(B, E * K).astype(jnp.int32)    # (B, E*K) -> SMEM

    kernel = functools.partial(_gather_einsum_kernel, E, K, J)

    out = pl.pallas_call(
        kernel,
        out_shape=jax.ShapeDtypeStruct((B, E * K, J), jnp.float32),
        grid_spec=pltpu.PrefetchScalarGridSpec(
            num_scalar_prefetch=1,                 # ind_flat lands in SMEM
            grid=(B,),
            in_specs=[
                pl.BlockSpec((None, T, 1), lambda b, ind: (b, 0, 0)),   # X[b, :, 0:1]
                pl.BlockSpec((E, J), lambda b, ind: (0, 0)),            # w_sum (resident)
            ],
            out_specs=pl.BlockSpec((None, E * K, J), lambda b, ind: (b, 0, 0)),
        ),
        compiler_params=pltpu.CompilerParams(
            dimension_semantics=("parallel",)),
    )(ind_flat, x0, w_sum)

    return out.reshape(B, E, K, J)


def reference_literal(X, ind, W):
    """Pure-JAX transcription of the literal torch forward."""
    B = X.shape[0]
    # torch.gather with un-expanded index: X_gathered[b,e,k,0] = X[b, ind[b,e,k], 0]
    xg = X[jnp.arange(B)[:, None, None], ind, 0]           # (B, E, K)
    # einsum 'beki,eij->bekj' with size-1 i broadcast then reduced over i
    w_sum = jnp.sum(W, axis=1)                              # (E, J)
    return xg[..., None] * w_sum[None, :, None, :]          # (B, E, K, J)


if __name__ == "__main__":
    B, T, I, J, E, K = 2, 16, 8, 16, 4, 8

    key = jax.random.PRNGKey(0)
    kx, ki, kw = jax.random.split(key, 3)
    X = jax.random.uniform(kx, (B, T, I), dtype=jnp.float32)
    ind = jax.random.randint(ki, (B, E, K), 0, T, dtype=jnp.int32)
    # Deterministic parameter init mimicking torch.rand(E, I, J)
    W = jax.random.uniform(kw, (E, I, J), dtype=jnp.float32)

    Y = gather_einsum(X, ind, W)
    Y = jax.block_until_ready(Y)

    Y_ref = reference_literal(X, ind, W)
    assert Y.shape == (B, E, K, J)
    assert jnp.allclose(Y, Y_ref, rtol=1e-5, atol=1e-5)
    print("KERNEL_OK")
</pallas_src>

<mosaic_0001>
module attributes {stable_mosaic.version = 11 : i64} {
  func.func @_gather_einsum_kernel(%arg0: i32, %arg1: memref<2x32xi32, #tpu.memory_space<smem>>, %arg2: memref<1x16x1xf32, #tpu.memory_space<vmem>>, %arg3: memref<4x16xf32, #tpu.memory_space<vmem>>, %arg4: memref<1x32x16xf32, #tpu.memory_space<vmem>>) attributes {dimension_semantics = [#tpu.dimension_semantics<parallel>], iteration_bounds = array<i64: 2>, scalar_prefetch = 1 : i64, scratch_operands = 0 : i64, tpu.core_type = #tpu.core_type<tc>, window_params = [{transform_indices = @transform_0, window_bounds = array<i64: 1, 16, 1>}, {pipeline_mode = #tpu.pipeline_mode<synchronous>, transform_indices = @transform_1, window_bounds = array<i64: 4, 16>}, {transform_indices = @transform_2, window_bounds = array<i64: 1, 32, 16>}]} {
    %c0 = arith.constant 0 : index
    %c0_0 = arith.constant 0 : index
    %0 = vector.load %arg3[%c0, %c0_0] : memref<4x16xf32, #tpu.memory_space<vmem>>, vector<1x16xf32>
    %1 = arith.index_cast %arg0 : i32 to index
    %c0_1 = arith.constant 0 : index
    %2 = memref.load %arg1[%1, %c0_1] : memref<2x32xi32, #tpu.memory_space<smem>>
    %c0_2 = arith.constant 0 : index
    %3 = arith.index_cast %2 : i32 to index
    %c0_3 = arith.constant 0 : index
    %4 = vector.load %arg2[%c0_2, %3, %c0_3] : memref<1x16x1xf32, #tpu.memory_space<vmem>>, vector<1x1x1xf32>
    %5 = vector.shape_cast %4 : vector<1x1x1xf32> to vector<1x1xf32>
    %6 = vector.broadcast %5 : vector<1x1xf32> to vector<1x16xf32>
    %7 = arith.mulf %6, %0 : vector<1x16xf32>
    %c0_4 = arith.constant 0 : index
    %c0_5 = arith.constant 0 : index
    %c0_6 = arith.constant 0 : index
    %8 = vector.load %arg4[%c0_4, %c0_5, %c0_6] : memref<1x32x16xf32, #tpu.memory_space<vmem>>, vector<1x1x16xf32>
    %9 = vector.shape_cast %8 : vector<1x1x16xf32> to vector<1x16xf32>
    %10 = vector.shape_cast %7 : vector<1x16xf32> to vector<1x1x16xf32>
    tpu.vector_store %arg4[%c0_4, %c0_5, %c0_6], %10 {strides = array<i32>} : memref<1x32x16xf32, #tpu.memory_space<vmem>>, vector<1x1x16xf32>,
    %11 = arith.index_cast %arg0 : i32 to index
    %c1 = arith.constant 1 : index
    %12 = memref.load %arg1[%11, %c1] : memref<2x32xi32, #tpu.memory_space<smem>>
    %c0_7 = arith.constant 0 : index
    %13 = arith.index_cast %12 : i32 to index
    %c0_8 = arith.constant 0 : index
    %14 = vector.load %arg2[%c0_7, %13, %c0_8] : memref<1x16x1xf32, #tpu.memory_space<vmem>>, vector<1x1x1xf32>
    %15 = vector.shape_cast %14 : vector<1x1x1xf32> to vector<1x1xf32>
    %16 = vector.broadcast %15 : vector<1x1xf32> to vector<1x16xf32>
    %17 = arith.mulf %16, %0 : vector<1x16xf32>
    %c0_9 = arith.constant 0 : index
    %c1_10 = arith.constant 1 : index
    %c0_11 = arith.constant 0 : index
    %18 = vector.load %arg4[%c0_9, %c1_10, %c0_11] : memref<1x32x16xf32, #tpu.memory_space<vmem>>, vector<1x1x16xf32>
    %19 = vector.shape_cast %18 : vector<1x1x16xf32> to vector<1x16xf32>
    %20 = vector.shape_cast %17 : vector<1x16xf32> to vector<1x1x16xf32>
    tpu.vector_store %arg4[%c0_9, %c1_10, %c0_11], %20 {strides = array<i32>} : memref<1x32x16xf32, #tpu.memory_space<vmem>>, vector<1x1x16xf32>,
    %21 = arith.index_cast %arg0 : i32 to index
    %c2 = arith.constant 2 : index
    %22 = memref.load %arg1[%21, %c2] : memref<2x32xi32, #tpu.memory_space<smem>>
    %c0_12 = arith.constant 0 : index
    %23 = arith.index_cast %22 : i32 to index
    %c0_13 = arith.constant 0 : index
    %24 = vector.load %arg2[%c0_12, %23, %c0_13] : memref<1x16x1xf32, #tpu.memory_space<vmem>>, vector<1x1x1xf32>
    %25 = vector.shape_cast %24 : vector<1x1x1xf32> to vector<1x1xf32>
    %26 = vector.broadcast %25 : vector<1x1xf32> to vector<1x16xf32>
    %27 = arith.mulf %26, %0 : vector<1x16xf32>
    %c0_14 = arith.constant 0 : index
    %c2_15 = arith.constant 2 : index
    %c0_16 = arith.constant 0 : index
    %28 = vector.load %arg4[%c0_14, %c2_15, %c0_16] : memref<1x32x16xf32, #tpu.memory_space<vmem>>, vector<1x1x16xf32>
    %29 = vector.shape_cast %28 : vector<1x1x16xf32> to vector<1x16xf32>
    %30 = vector.shape_cast %27 : vector<1x16xf32> to vector<1x1x16xf32>
    tpu.vector_store %arg4[%c0_14, %c2_15, %c0_16], %30 {strides = array<i32>} : memref<1x32x16xf32, #tpu.memory_space<vmem>>, vector<1x1x16xf32>,
    %31 = arith.index_cast %arg0 : i32 to index
    %c3 = arith.constant 3 : index
    %32 = memref.load %arg1[%31, %c3] : memref<2x32xi32, #tpu.memory_space<smem>>
    %c0_17 = arith.constant 0 : index
    %33 = arith.index_cast %32 : i32 to index
    %c0_18 = arith.constant 0 : index
    %34 = vector.load %arg2[%c0_17, %33, %c0_18] : memref<1x16x1xf32, #tpu.memory_space<vmem>>, vector<1x1x1xf32>
    %35 = vector.shape_cast %34 : vector<1x1x1xf32> to vector<1x1xf32>
    %36 = vector.broadcast %35 : vector<1x1xf32> to vector<1x16xf32>
    %37 = arith.mulf %36, %0 : vector<1x16xf32>
    %c0_19 = arith.constant 0 : index
    %c3_20 = arith.constant 3 : index
    %c0_21 = arith.constant 0 : index
    %38 = vector.load %arg4[%c0_19, %c3_20, %c0_21] : memref<1x32x16xf32, #tpu.memory_space<vmem>>, vector<1x1x16xf32>
    %39 = vector.shape_cast %38 : vector<1x1x16xf32> to vector<1x16xf32>
    %40 = vector.shape_cast %37 : vector<1x16xf32> to vector<1x1x16xf32>
    tpu.vector_store %arg4[%c0_19, %c3_20, %c0_21], %40 {strides = array<i32>} : memref<1x32x16xf32, #tpu.memory_space<vmem>>, vector<1x1x16xf32>,
    %41 = arith.index_cast %arg0 : i32 to index
    %c4 = arith.constant 4 : index
    %42 = memref.load %arg1[%41, %c4] : memref<2x32xi32, #tpu.memory_space<smem>>
    %c0_22 = arith.constant 0 : index
    %43 = arith.index_cast %42 : i32 to index
    %c0_23 = arith.constant 0 : index
    %44 = vector.load %arg2[%c0_22, %43, %c0_23] : memref<1x16x1xf32, #tpu.memory_space<vmem>>, vector<1x1x1xf32>
    %45 = vector.shape_cast %44 : vector<1x1x1xf32> to vector<1x1xf32>
    %46 = vector.broadcast %45 : vector<1x1xf32> to vector<1x16xf32>
    %47 = arith.mulf %46, %0 : vector<1x16xf32>
    %c0_24 = arith.constant 0 : index
    %c4_25 = arith.constant 4 : index
    %c0_26 = arith.constant 0 : index
    %48 = vector.load %arg4[%c0_24, %c4_25, %c0_26] : memref<1x32x16xf32, #tpu.memory_space<vmem>>, vector<1x1x16xf32>
    %49 = vector.shape_cast %48 : vector<1x1x16xf32> to vector<1x16xf32>
    %50 = vector.shape_cast %47 : vector<1x16xf32> to vector<1x1x16xf32>
    tpu.vector_store %arg4[%c0_24, %c4_25, %c0_26], %50 {strides = array<i32>} : memref<1x32x16xf32, #tpu.memory_space<vmem>>, vector<1x1x16xf32>,
    %51 = arith.index_cast %arg0 : i32 to index
    %c5 = arith.constant 5 : index
    %52 = memref.load %arg1[%51, %c5] : memref<2x32xi32, #tpu.memory_space<smem>>
    %c0_27 = arith.constant 0 : index
    %53 = arith.index_cast %52 : i32 to index
    %c0_28 = arith.constant 0 : index
    %54 = vector.load %arg2[%c0_27, %53, %c0_28] : memref<1x16x1xf32, #tpu.memory_space<vmem>>, vector<1x1x1xf32>
    %55 = vector.shape_cast %54 : vector<1x1x1xf32> to vector<1x1xf32>
    %56 = vector.broadcast %55 : vector<1x1xf32> to vector<1x16xf32>
    %57 = arith.mulf %56, %0 : vector<1x16xf32>
    %c0_29 = arith.constant 0 : index
    %c5_30 = arith.constant 5 : index
    %c0_31 = arith.constant 0 : index
    %58 = vector.load %arg4[%c0_29, %c5_30, %c0_31] : memref<1x32x16xf32, #tpu.memory_space<vmem>>, vector<1x1x16xf32>
    %59 = vector.shape_cast %58 : vector<1x1x16xf32> to vector<1x16xf32>
    %60 = vector.shape_cast %57 : vector<1x16xf32> to vector<1x1x16xf32>
    tpu.vector_store %arg4[%c0_29, %c5_30, %c0_31], %60 {strides = array<i32>} : memref<1x32x16xf32, #tpu.memory_space<vmem>>, vector<1x1x16xf32>,
    %61 = arith.index_cast %arg0 : i32 to index
    %c6 = arith.constant 6 : index
    %62 = memref.load %arg1[%61, %c6] : memref<2x32xi32, #tpu.memory_space<smem>>
    %c0_32 = arith.constant 0 : index
    %63 = arith.index_cast %62 : i32 to index
    %c0_33 = arith.constant 0 : index
    %64 = vector.load %arg2[%c0_32, %63, %c0_33] : memref<1x16x1xf32, #tpu.memory_space<vmem>>, vector<1x1x1xf32>
    %65 = vector.shape_cast %64 : vector<1x1x1xf32> to vector<1x1xf32>
    %66 = vector.broadcast %65 : vector<1x1xf32> to vector<1x16xf32>
    %67 = arith.mulf %66, %0 : vector<1x16xf32>
    %c0_34 = arith.constant 0 : index
    %c6_35 = arith.constant 6 : index
    %c0_36 = arith.constant 0 : index
    %68 = vector.load %arg4[%c0_34, %c6_35, %c0_36] : memref<1x32x16xf32, #tpu.memory_space<vmem>>, vector<1x1x16xf32>
    %69 = vector.shape_cast %68 : vector<1x1x16xf32> to vector<1x16xf32>
    %70 = vector.shape_cast %67 : vector<1x16xf32> to vector<1x1x16xf32>
    tpu.vector_store %arg4[%c0_34, %c6_35, %c0_36], %70 {strides = array<i32>} : memref<1x32x16xf32, #tpu.memory_space<vmem>>, vector<1x1x16xf32>,
    %71 = arith.index_cast %arg0 : i32 to index
    %c7 = arith.constant 7 : index
    %72 = memref.load %arg1[%71, %c7] : memref<2x32xi32, #tpu.memory_space<smem>>
    %c0_37 = arith.constant 0 : index
    %73 = arith.index_cast %72 : i32 to index
    %c0_38 = arith.constant 0 : index
    %74 = vector.load %arg2[%c0_37, %73, %c0_38] : memref<1x16x1xf32, #tpu.memory_space<vmem>>, vector<1x1x1xf32>
    %75 = vector.shape_cast %74 : vector<1x1x1xf32> to vector<1x1xf32>
    %76 = vector.broadcast %75 : vector<1x1xf32> to vector<1x16xf32>
    %77 = arith.mulf %76, %0 : vector<1x16xf32>
    %c0_39 = arith.constant 0 : index
    %c7_40 = arith.constant 7 : index
    %c0_41 = arith.constant 0 : index
    %78 = vector.load %arg4[%c0_39, %c7_40, %c0_41] : memref<1x32x16xf32, #tpu.memory_space<vmem>>, vector<1x1x16xf32>
    %79 = vector.shape_cast %78 : vector<1x1x16xf32> to vector<1x16xf32>
    %80 = vector.shape_cast %77 : vector<1x16xf32> to vector<1x1x16xf32>
    tpu.vector_store %arg4[%c0_39, %c7_40, %c0_41], %80 {strides = array<i32>} : memref<1x32x16xf32, #tpu.memory_space<vmem>>, vector<1x1x16xf32>,
    %c1_42 = arith.constant 1 : index
    %c0_43 = arith.constant 0 : index
    %81 = vector.load %arg3[%c1_42, %c0_43] : memref<4x16xf32, #tpu.memory_space<vmem>>, vector<1x16xf32>
    %82 = arith.index_cast %arg0 : i32 to index
    %c8 = arith.constant 8 : index
    %83 = memref.load %arg1[%82, %c8] : memref<2x32xi32, #tpu.memory_space<smem>>
    %c0_44 = arith.constant 0 : index
    %84 = arith.index_cast %83 : i32 to index
    %c0_45 = arith.constant 0 : index
    %85 = vector.load %arg2[%c0_44, %84, %c0_45] : memref<1x16x1xf32, #tpu.memory_space<vmem>>, vector<1x1x1xf32>
    %86 = vector.shape_cast %85 : vector<1x1x1xf32> to vector<1x1xf32>
    %87 = vector.broadcast %86 : vector<1x1xf32> to vector<1x16xf32>
    %88 = arith.mulf %87, %81 : vector<1x16xf32>
    %c0_46 = arith.constant 0 : index
    %c8_47 = arith.constant 8 : index
    %c0_48 = arith.constant 0 : index
    %89 = vector.load %arg4[%c0_46, %c8_47, %c0_48] : memref<1x32x16xf32, #tpu.memory_space<vmem>>, vector<1x1x16xf32>
    %90 = vector.shape_cast %89 : vector<1x1x16xf32> to vector<1x16xf32>
    %91 = vector.shape_cast %88 : vector<1x16xf32> to vector<1x1x16xf32>
    tpu.vector_store %arg4[%c0_46, %c8_47, %c0_48], %91 {strides = array<i32>} : memref<1x32x16xf32, #tpu.memory_space<vmem>>, vector<1x1x16xf32>,
    %92 = arith.index_cast %arg0 : i32 to index
    %c9 = arith.constant 9 : index
    %93 = memref.load %arg1[%92, %c9] : memref<2x32xi32, #tpu.memory_space<smem>>
    %c0_49 = arith.constant 0 : index
    %94 = arith.index_cast %93 : i32 to index
    %c0_50 = arith.constant 0 : index
    %95 = vector.load %arg2[%c0_49, %94, %c0_50] : memref<1x16x1xf32, #tpu.memory_space<vmem>>, vector<1x1x1xf32>
    %96 = vector.shape_cast %95 : vector<1x1x1xf32> to vector<1x1xf32>
    %97 = vector.broadcast %96 : vector<1x1xf32> to vector<1x16xf32>
    %98 = arith.mulf %97, %81 : vector<1x16xf32>
    %c0_51 = arith.constant 0 : index
    %c9_52 = arith.constant 9 : index
    %c0_53 = arith.constant 0 : index
    %99 = vector.load %arg4[%c0_51, %c9_52, %c0_53] : memref<1x32x16xf32, #tpu.memory_space<vmem>>, vector<1x1x16xf32>
    %100 = vector.shape_cast %99 : vector<1x1x16xf32> to vector<1x16xf32>
    %101 = vector.shape_cast %98 : vector<1x16xf32> to vector<1x1x16xf32>
    tpu.vector_store %arg4[%c0_51, %c9_52, %c0_53], %101 {strides = array<i32>} : memref<1x32x16xf32, #tpu.memory_space<vmem>>, vector<1x1x16xf32>,
    %102 = arith.index_cast %arg0 : i32 to index
    %c10 = arith.constant 10 : index
    %103 = memref.load %arg1[%102, %c10] : memref<2x32xi32, #tpu.memory_space<smem>>
    %c0_54 = arith.constant 0 : index
    %104 = arith.index_cast %103 : i32 to index
    %c0_55 = arith.constant 0 : index
    %105 = vector.load %arg2[%c0_54, %104, %c0_55] : memref<1x16x1xf32, #tpu.memory_space<vmem>>, vector<1x1x1xf32>
    %106 = vector.shape_cast %105 : vector<1x1x1xf32> to vector<1x1xf32>
    %107 = vector.broadcast %106 : vector<1x1xf32> to vector<1x16xf32>
    %108 = arith.mulf %107, %81 : vector<1x16xf32>
    %c0_56 = arith.constant 0 : index
    %c10_57 = arith.constant 10 : index
    %c0_58 = arith.constant 0 : index
    %109 = vector.load %arg4[%c0_56, %c10_57, %c0_58] : memref<1x32x16xf32, #tpu.memory_space<vmem>>, vector<1x1x16xf32>
    %110 = vector.shape_cast %109 : vector<1x1x16xf32> to vector<1x16xf32>
    %111 = vector.shape_cast %108 : vector<1x16xf32> to vector<1x1x16xf32>
    tpu.vector_store %arg4[%c0_56, %c10_57, %c0_58], %111 {strides = array<i32>} : memref<1x32x16xf32, #tpu.memory_space<vmem>>, vector<1x1x16xf32>,
    %112 = arith.index_cast %arg0 : i32 to index
    %c11 = arith.constant 11 : index
    %113 = memref.load %arg1[%112, %c11] : memref<2x32xi32, #tpu.memory_space<smem>>
    %c0_59 = arith.constant 0 : index
    %114 = arith.index_cast %113 : i32 to index
    %c0_60 = arith.constant 0 : index
    %115 = vector.load %arg2[%c0_59, %114, %c0_60] : memref<1x16x1xf32, #tpu.memory_space<vmem>>, vector<1x1x1xf32>
    %116 = vector.shape_cast %115 : vector<1x1x1xf32> to vector<1x1xf32>
    %117 = vector.broadcast %116 : vector<1x1xf32> to vector<1x16xf32>
    %118 = arith.mulf %117, %81 : vector<1x16xf32>
    %c0_61 = arith.constant 0 : index
    %c11_62 = arith.constant 11 : index
    %c0_63 = arith.constant 0 : index
    %119 = vector.load %arg4[%c0_61, %c11_62, %c0_63] : memref<1x32x16xf32, #tpu.memory_space<vmem>>, vector<1x1x16xf32>
    %120 = vector.shape_cast %119 : vector<1x1x16xf32> to vector<1x16xf32>
    %121 = vector.shape_cast %118 : vector<1x16xf32> to vector<1x1x16xf32>
    tpu.vector_store %arg4[%c0_61, %c11_62, %c0_63], %121 {strides = array<i32>} : memref<1x32x16xf32, #tpu.memory_space<vmem>>, vector<1x1x16xf32>,
    %122 = arith.index_cast %arg0 : i32 to index
    %c12 = arith.constant 12 : index
    %123 = memref.load %arg1[%122, %c12] : memref<2x32xi32, #tpu.memory_space<smem>>
    %c0_64 = arith.constant 0 : index
    %124 = arith.index_cast %123 : i32 to index
    %c0_65 = arith.constant 0 : index
    %125 = vector.load %arg2[%c0_64, %124, %c0_65] : memref<1x16x1xf32, #tpu.memory_space<vmem>>, vector<1x1x1xf32>
    %126 = vector.shape_cast %125 : vector<1x1x1xf32> to vector<1x1xf32>
    %127 = vector.broadcast %126 : vector<1x1xf32> to vector<1x16xf32>
    %128 = arith.mulf %127, %81 : vector<1x16xf32>
    %c0_66 = arith.constant 0 : index
    %c12_67 = arith.constant 12 : index
    %c0_68 = arith.constant 0 : index
    %129 = vector.load %arg4[%c0_66, %c12_67, %c0_68] : memref<1x32x16xf32, #tpu.memory_space<vmem>>, vector<1x1x16xf32>
    %130 = vector.shape_cast %129 : vector<1x1x16xf32> to vector<1x16xf32>
    %131 = vector.shape_cast %128 : vector<1x16xf32> to vector<1x1x16xf32>
    tpu.vector_store %arg4[%c0_66, %c12_67, %c0_68], %131 {strides = array<i32>} : memref<1x32x16xf32, #tpu.memory_space<vmem>>, vector<1x1x16xf32>,
    %132 = arith.index_cast %arg0 : i32 to index
    %c13 = arith.constant 13 : index
    %133 = memref.load %arg1[%132, %c13] : memref<2x32xi32, #tpu.memory_space<smem>>
    %c0_69 = arith.constant 0 : index
    %134 = arith.index_cast %133 : i32 to index
    %c0_70 = arith.constant 0 : index
    %135 = vector.load %arg2[%c0_69, %134, %c0_70] : memref<1x16x1xf32, #tpu.memory_space<vmem>>, vector<1x1x1xf32>
    %136 = vector.shape_cast %135 : vector<1x1x1xf32> to vector<1x1xf32>
    %137 = vector.broadcast %136 : vector<1x1xf32> to vector<1x16xf32>
    %138 = arith.mulf %137, %81 : vector<1x16xf32>
    %c0_71 = arith.constant 0 : index
    %c13_72 = arith.constant 13 : index
    %c0_73 = arith.constant 0 : index
    %139 = vector.load %arg4[%c0_71, %c13_72, %c0_73] : memref<1x32x16xf32, #tpu.memory_space<vmem>>, vector<1x1x16xf32>
    %140 = vector.shape_cast %139 : vector<1x1x16xf32> to vector<1x16xf32>
    %141 = vector.shape_cast %138 : vector<1x16xf32> to vector<1x1x16xf32>
    tpu.vector_store %arg4[%c0_71, %c13_72, %c0_73], %141 {strides = array<i32>} : memref<1x32x16xf32, #tpu.memory_space<vmem>>, vector<1x1x16xf32>,
    %142 = arith.index_cast %arg0 : i32 to index
    %c14 = arith.constant 14 : index
    %143 = memref.load %arg1[%142, %c14] : memref<2x32xi32, #tpu.memory_space<smem>>
    %c0_74 = arith.constant 0 : index
    %144 = arith.index_cast %143 : i32 to index
    %c0_75 = arith.constant 0 : index
    %145 = vector.load %arg2[%c0_74, %144, %c0_75] : memref<1x16x1xf32, #tpu.memory_space<vmem>>, vector<1x1x1xf32>
    %146 = vector.shape_cast %145 : vector<1x1x1xf32> to vector<1x1xf32>
    %147 = vector.broadcast %146 : vector<1x1xf32> to vector<1x16xf32>
    %148 = arith.mulf %147, %81 : vector<1x16xf32>
    %c0_76 = arith.constant 0 : index
    %c14_77 = arith.constant 14 : index
    %c0_78 = arith.constant 0 : index
    %149 = vector.load %arg4[%c0_76, %c14_77, %c0_78] : memref<1x32x16xf32, #tpu.memory_space<vmem>>, vector<1x1x16xf32>
    %150 = vector.shape_cast %149 : vector<1x1x16xf32> to vector<1x16xf32>
    %151 = vector.shape_cast %148 : vector<1x16xf32> to vector<1x1x16xf32>
    tpu.vector_store %arg4[%c0_76, %c14_77, %c0_78], %151 {strides = array<i32>} : memref<1x32x16xf32, #tpu.memory_space<vmem>>, vector<1x1x16xf32>,
    %152 = arith.index_cast %arg0 : i32 to index
    %c15 = arith.constant 15 : index
    %153 = memref.load %arg1[%152, %c15] : memref<2x32xi32, #tpu.memory_space<smem>>
    %c0_79 = arith.constant 0 : index
    %154 = arith.index_cast %153 : i32 to index
    %c0_80 = arith.constant 0 : index
    %155 = vector.load %arg2[%c0_79, %154, %c0_80] : memref<1x16x1xf32, #tpu.memory_space<vmem>>, vector<1x1x1xf32>
    %156 = vector.shape_cast %155 : vector<1x1x1xf32> to vector<1x1xf32>
    %157 = vector.broadcast %156 : vector<1x1xf32> to vector<1x16xf32>
    %158 = arith.mulf %157, %81 : vector<1x16xf32>
    %c0_81 = arith.constant 0 : index
    %c15_82 = arith.constant 15 : index
    %c0_83 = arith.constant 0 : index
    %159 = vector.load %arg4[%c0_81, %c15_82, %c0_83] : memref<1x32x16xf32, #tpu.memory_space<vmem>>, vector<1x1x16xf32>
    %160 = vector.shape_cast %159 : vector<1x1x16xf32> to vector<1x16xf32>
    %161 = vector.shape_cast %158 : vector<1x16xf32> to vector<1x1x16xf32>
    tpu.vector_store %arg4[%c0_81, %c15_82, %c0_83], %161 {strides = array<i32>} : memref<1x32x16xf32, #tpu.memory_space<vmem>>, vector<1x1x16xf32>,
    %c2_84 = arith.constant 2 : index
    %c0_85 = arith.constant 0 : index
    %162 = vector.load %arg3[%c2_84, %c0_85] : memref<4x16xf32, #tpu.memory_space<vmem>>, vector<1x16xf32>
    %163 = arith.index_cast %arg0 : i32 to index
    %c16 = arith.constant 16 : index
    %164 = memref.load %arg1[%163, %c16] : memref<2x32xi32, #tpu.memory_space<smem>>
    %c0_86 = arith.constant 0 : index
    %165 = arith.index_cast %164 : i32 to index
    %c0_87 = arith.constant 0 : index
    %166 = vector.load %arg2[%c0_86, %165, %c0_87] : memref<1x16x1xf32, #tpu.memory_space<vmem>>, vector<1x1x1xf32>
    %167 = vector.shape_cast %166 : vector<1x1x1xf32> to vector<1x1xf32>
    %168 = vector.broadcast %167 : vector<1x1xf32> to vector<1x16xf32>
    %169 = arith.mulf %168, %162 : vector<1x16xf32>
    %c0_88 = arith.constant 0 : index
    %c16_89 = arith.constant 16 : index
    %c0_90 = arith.constant 0 : index
    %170 = vector.load %arg4[%c0_88, %c16_89, %c0_90] : memref<1x32x16xf32, #tpu.memory_space<vmem>>, vector<1x1x16xf32>
    %171 = vector.shape_cast %170 : vector<1x1x16xf32> to vector<1x16xf32>
    %172 = vector.shape_cast %169 : vector<1x16xf32> to vector<1x1x16xf32>
    tpu.vector_store %arg4[%c0_88, %c16_89, %c0_90], %172 {strides = array<i32>} : memref<1x32x16xf32, #tpu.memory_space<vmem>>, vector<1x1x16xf32>,
    %173 = arith.index_cast %arg0 : i32 to index
    %c17 = arith.constant 17 : index
    %174 = memref.load %arg1[%173, %c17] : memref<2x32xi32, #tpu.memory_space<smem>>
    %c0_91 = arith.constant 0 : index
    %175 = arith.index_cast %174 : i32 to index
    %c0_92 = arith.constant 0 : index
    %176 = vector.load %arg2[%c0_91, %175, %c0_92] : memref<1x16x1xf32, #tpu.memory_space<vmem>>, vector<1x1x1xf32>
    %177 = vector.shape_cast %176 : vector<1x1x1xf32> to vector<1x1xf32>
    %178 = vector.broadcast %177 : vector<1x1xf32> to vector<1x16xf32>
    %179 = arith.mulf %178, %162 : vector<1x16xf32>
    %c0_93 = arith.constant 0 : index
    %c17_94 = arith.constant 17 : index
    %c0_95 = arith.constant 0 : index
    %180 = vector.load %arg4[%c0_93, %c17_94, %c0_95] : memref<1x32x16xf32, #tpu.memory_space<vmem>>, vector<1x1x16xf32>
    %181 = vector.shape_cast %180 : vector<1x1x16xf32> to vector<1x16xf32>
    %182 = vector.shape_cast %179 : vector<1x16xf32> to vector<1x1x16xf32>
    tpu.vector_store %arg4[%c0_93, %c17_94, %c0_95], %182 {strides = array<i32>} : memref<1x32x16xf32, #tpu.memory_space<vmem>>, vector<1x1x16xf32>,
    %183 = arith.index_cast %arg0 : i32 to index
    %c18 = arith.constant 18 : index
    %184 = memref.load %arg1[%183, %c18] : memref<2x32xi32, #tpu.memory_space<smem>>
    %c0_96 = arith.constant 0 : index
    %185 = arith.index_cast %184 : i32 to index
    %c0_97 = arith.constant 0 : index
    %186 = vector.load %arg2[%c0_96, %185, %c0_97] : memref<1x16x1xf32, #tpu.memory_space<vmem>>, vector<1x1x1xf32>
    %187 = vector.shape_cast %186 : vector<1x1x1xf32> to vector<1x1xf32>
    %188 = vector.broadcast %187 : vector<1x1xf32> to vector<1x16xf32>
    %189 = arith.mulf %188, %162 : vector<1x16xf32>
    %c0_98 = arith.constant 0 : index
    %c18_99 = arith.constant 18 : index
    %c0_100 = arith.constant 0 : index
    %190 = vector.load %arg4[%c0_98, %c18_99, %c0_100] : memref<1x32x16xf32, #tpu.memory_space<vmem>>, vector<1x1x16xf32>
    %191 = vector.shape_cast %190 : vector<1x1x16xf32> to vector<1x16xf32>
    %192 = vector.shape_cast %189 : vector<1x16xf32> to vector<1x1x16xf32>
    tpu.vector_store %arg4[%c0_98, %c18_99, %c0_100], %192 {strides = array<i32>} : memref<1x32x16xf32, #tpu.memory_space<vmem>>, vector<1x1x16xf32>,
    %193 = arith.index_cast %arg0 : i32 to index
    %c19 = arith.constant 19 : index
    %194 = memref.load %arg1[%193, %c19] : memref<2x32xi32, #tpu.memory_space<smem>>
    %c0_101 = arith.constant 0 : index
    %195 = arith.index_cast %194 : i32 to index
    %c0_102 = arith.constant 0 : index
    %196 = vector.load %arg2[%c0_101, %195, %c0_102] : memref<1x16x1xf32, #tpu.memory_space<vmem>>, vector<1x1x1xf32>
    %197 = vector.shape_cast %196 : vector<1x1x1xf32> to vector<1x1xf32>
    %198 = vector.broadcast %197 : vector<1x1xf32> to vector<1x16xf32>
    %199 = arith.mulf %198, %162 : vector<1x16xf32>
    %c0_103 = arith.constant 0 : index
    %c19_104 = arith.constant 19 : index
    %c0_105 = arith.constant 0 : index
    %200 = vector.load %arg4[%c0_103, %c19_104, %c0_105] : memref<1x32x16xf32, #tpu.memory_space<vmem>>, vector<1x1x16xf32>
    %201 = vector.shape_cast %200 : vector<1x1x16xf32> to vector<1x16xf32>
    %202 = vector.shape_cast %199 : vector<1x16xf32> to vector<1x1x16xf32>
    tpu.vector_store %arg4[%c0_103, %c19_104, %c0_105], %202 {strides = array<i32>} : memref<1x32x16xf32, #tpu.memory_space<vmem>>, vector<1x1x16xf32>,
    %203 = arith.index_cast %arg0 : i32 to index
    %c20 = arith.constant 20 : index
    %204 = memref.load %arg1[%203, %c20] : memref<2x32xi32, #tpu.memory_space<smem>>
    %c0_106 = arith.constant 0 : index
    %205 = arith.index_cast %204 : i32 to index
    %c0_107 = arith.constant 0 : index
    %206 = vector.load %arg2[%c0_106, %205, %c0_107] : memref<1x16x1xf32, #tpu.memory_space<vmem>>, vector<1x1x1xf32>
    %207 = vector.shape_cast %206 : vector<1x1x1xf32> to vector<1x1xf32>
    %208 = vector.broadcast %207 : vector<1x1xf32> to vector<1x16xf32>
    %209 = arith.mulf %208, %162 : vector<1x16xf32>
    %c0_108 = arith.constant 0 : index
    %c20_109 = arith.constant 20 : index
    %c0_110 = arith.constant 0 : index
    %210 = vector.load %arg4[%c0_108, %c20_109, %c0_110] : memref<1x32x16xf32, #tpu.memory_space<vmem>>, vector<1x1x16xf32>
    %211 = vector.shape_cast %210 : vector<1x1x16xf32> to vector<1x16xf32>
    %212 = vector.shape_cast %209 : vector<1x16xf32> to vector<1x1x16xf32>
    tpu.vector_store %arg4[%c0_108, %c20_109, %c0_110], %212 {strides = array<i32>} : memref<1x32x16xf32, #tpu.memory_space<vmem>>, vector<1x1x16xf32>,
    %213 = arith.index_cast %arg0 : i32 to index
    %c21 = arith.constant 21 : index
    %214 = memref.load %arg1[%213, %c21] : memref<2x32xi32, #tpu.memory_space<smem>>
    %c0_111 = arith.constant 0 : index
    %215 = arith.index_cast %214 : i32 to index
    %c0_112 = arith.constant 0 : index
    %216 = vector.load %arg2[%c0_111, %215, %c0_112] : memref<1x16x1xf32, #tpu.memory_space<vmem>>, vector<1x1x1xf32>
    %217 = vector.shape_cast %216 : vector<1x1x1xf32> to vector<1x1xf32>
    %218 = vector.broadcast %217 : vector<1x1xf32> to vector<1x16xf32>
    %219 = arith.mulf %218, %162 : vector<1x16xf32>
    %c0_113 = arith.constant 0 : index
    %c21_114 = arith.constant 21 : index
    %c0_115 = arith.constant 0 : index
    %220 = vector.load %arg4[%c0_113, %c21_114, %c0_115] : memref<1x32x16xf32, #tpu.memory_space<vmem>>, vector<1x1x16xf32>
    %221 = vector.shape_cast %220 : vector<1x1x16xf32> to vector<1x16xf32>
    %222 = vector.shape_cast %219 : vector<1x16xf32> to vector<1x1x16xf32>
    tpu.vector_store %arg4[%c0_113, %c21_114, %c0_115], %222 {strides = array<i32>} : memref<1x32x16xf32, #tpu.memory_space<vmem>>, vector<1x1x16xf32>,
    %223 = arith.index_cast %arg0 : i32 to index
    %c22 = arith.constant 22 : index
    %224 = memref.load %arg1[%223, %c22] : memref<2x32xi32, #tpu.memory_space<smem>>
    %c0_116 = arith.constant 0 : index
    %225 = arith.index_cast %224 : i32 to index
    %c0_117 = arith.constant 0 : index
    %226 = vector.load %arg2[%c0_116, %225, %c0_117] : memref<1x16x1xf32, #tpu.memory_space<vmem>>, vector<1x1x1xf32>
    %227 = vector.shape_cast %226 : vector<1x1x1xf32> to vector<1x1xf32>
    %228 = vector.broadcast %227 : vector<1x1xf32> to vector<1x16xf32>
    %229 = arith.mulf %228, %162 : vector<1x16xf32>
    %c0_118 = arith.constant 0 : index
    %c22_119 = arith.constant 22 : index
    %c0_120 = arith.constant 0 : index
    %230 = vector.load %arg4[%c0_118, %c22_119, %c0_120] : memref<1x32x16xf32, #tpu.memory_space<vmem>>, vector<1x1x16xf32>
    %231 = vector.shape_cast %230 : vector<1x1x16xf32> to vector<1x16xf32>
    %232 = vector.shape_cast %229 : vector<1x16xf32> to vector<1x1x16xf32>
    tpu.vector_store %arg4[%c0_118, %c22_119, %c0_120], %232 {strides = array<i32>} : memref<1x32x16xf32, #tpu.memory_space<vmem>>, vector<1x1x16xf32>,
    %233 = arith.index_cast %arg0 : i32 to index
    %c23 = arith.constant 23 : index
    %234 = memref.load %arg1[%233, %c23] : memref<2x32xi32, #tpu.memory_space<smem>>
    %c0_121 = arith.constant 0 : index
    %235 = arith.index_cast %234 : i32 to index
    %c0_122 = arith.constant 0 : index
    %236 = vector.load %arg2[%c0_121, %235, %c0_122] : memref<1x16x1xf32, #tpu.memory_space<vmem>>, vector<1x1x1xf32>
    %237 = vector.shape_cast %236 : vector<1x1x1xf32> to vector<1x1xf32>
    %238 = vector.broadcast %237 : vector<1x1xf32> to vector<1x16xf32>
    %239 = arith.mulf %238, %162 : vector<1x16xf32>
    %c0_123 = arith.constant 0 : index
    %c23_124 = arith.constant 23 : index
    %c0_125 = arith.constant 0 : index
    %240 = vector.load %arg4[%c0_123, %c23_124, %c0_125] : memref<1x32x16xf32, #tpu.memory_space<vmem>>, vector<1x1x16xf32>
    %241 = vector.shape_cast %240 : vector<1x1x16xf32> to vector<1x16xf32>
    %242 = vector.shape_cast %239 : vector<1x16xf32> to vector<1x1x16xf32>
    tpu.vector_store %arg4[%c0_123, %c23_124, %c0_125], %242 {strides = array<i32>} : memref<1x32x16xf32, #tpu.memory_space<vmem>>, vector<1x1x16xf32>,
    %c3_126 = arith.constant 3 : index
    %c0_127 = arith.constant 0 : index
    %243 = vector.load %arg3[%c3_126, %c0_127] : memref<4x16xf32, #tpu.memory_space<vmem>>, vector<1x16xf32>
    %244 = arith.index_cast %arg0 : i32 to index
    %c24 = arith.constant 24 : index
    %245 = memref.load %arg1[%244, %c24] : memref<2x32xi32, #tpu.memory_space<smem>>
    %c0_128 = arith.constant 0 : index
    %246 = arith.index_cast %245 : i32 to index
    %c0_129 = arith.constant 0 : index
    %247 = vector.load %arg2[%c0_128, %246, %c0_129] : memref<1x16x1xf32, #tpu.memory_space<vmem>>, vector<1x1x1xf32>
    %248 = vector.shape_cast %247 : vector<1x1x1xf32> to vector<1x1xf32>
    %249 = vector.broadcast %248 : vector<1x1xf32> to vector<1x16xf32>
    %250 = arith.mulf %249, %243 : vector<1x16xf32>
    %c0_130 = arith.constant 0 : index
    %c24_131 = arith.constant 24 : index
    %c0_132 = arith.constant 0 : index
    %251 = vector.load %arg4[%c0_130, %c24_131, %c0_132] : memref<1x32x16xf32, #tpu.memory_space<vmem>>, vector<1x1x16xf32>
    %252 = vector.shape_cast %251 : vector<1x1x16xf32> to vector<1x16xf32>
    %253 = vector.shape_cast %250 : vector<1x16xf32> to vector<1x1x16xf32>
    tpu.vector_store %arg4[%c0_130, %c24_131, %c0_132], %253 {strides = array<i32>} : memref<1x32x16xf32, #tpu.memory_space<vmem>>, vector<1x1x16xf32>,
    %254 = arith.index_cast %arg0 : i32 to index
    %c25 = arith.constant 25 : index
    %255 = memref.load %arg1[%254, %c25] : memref<2x32xi32, #tpu.memory_space<smem>>
    %c0_133 = arith.constant 0 : index
    %256 = arith.index_cast %255 : i32 to index
    %c0_134 = arith.constant 0 : index
    %257 = vector.load %arg2[%c0_133, %256, %c0_134] : memref<1x16x1xf32, #tpu.memory_space<vmem>>, vector<1x1x1xf32>
    %258 = vector.shape_cast %257 : vector<1x1x1xf32> to vector<1x1xf32>
    %259 = vector.broadcast %258 : vector<1x1xf32> to vector<1x16xf32>
    %260 = arith.mulf %259, %243 : vector<1x16xf32>
    %c0_135 = arith.constant 0 : index
    %c25_136 = arith.constant 25 : index
    %c0_137 = arith.constant 0 : index
    %261 = vector.load %arg4[%c0_135, %c25_136, %c0_137] : memref<1x32x16xf32, #tpu.memory_space<vmem>>, vector<1x1x16xf32>
    %262 = vector.shape_cast %261 : vector<1x1x16xf32> to vector<1x16xf32>
    %263 = vector.shape_cast %260 : vector<1x16xf32> to vector<1x1x16xf32>
    tpu.vector_store %arg4[%c0_135, %c25_136, %c0_137], %263 {strides = array<i32>} : memref<1x32x16xf32, #tpu.memory_space<vmem>>, vector<1x1x16xf32>,
    %264 = arith.index_cast %arg0 : i32 to index
    %c26 = arith.constant 26 : index
    %265 = memref.load %arg1[%264, %c26] : memref<2x32xi32, #tpu.memory_space<smem>>
    %c0_138 = arith.constant 0 : index
    %266 = arith.index_cast %265 : i32 to index
    %c0_139 = arith.constant 0 : index
    %267 = vector.load %arg2[%c0_138, %266, %c0_139] : memref<1x16x1xf32, #tpu.memory_space<vmem>>, vector<1x1x1xf32>
    %268 = vector.shape_cast %267 : vector<1x1x1xf32> to vector<1x1xf32>
    %269 = vector.broadcast %268 : vector<1x1xf32> to vector<1x16xf32>
    %270 = arith.mulf %269, %243 : vector<1x16xf32>
    %c0_140 = arith.constant 0 : index
    %c26_141 = arith.constant 26 : index
    %c0_142 = arith.constant 0 : index
    %271 = vector.load %arg4[%c0_140, %c26_141, %c0_142] : memref<1x32x16xf32, #tpu.memory_space<vmem>>, vector<1x1x16xf32>
    %272 = vector.shape_cast %271 : vector<1x1x16xf32> to vector<1x16xf32>
    %273 = vector.shape_cast %270 : vector<1x16xf32> to vector<1x1x16xf32>
    tpu.vector_store %arg4[%c0_140, %c26_141, %c0_142], %273 {strides = array<i32>} : memref<1x32x16xf32, #tpu.memory_space<vmem>>, vector<1x1x16xf32>,
    %274 = arith.index_cast %arg0 : i32 to index
    %c27 = arith.constant 27 : index
    %275 = memref.load %arg1[%274, %c27] : memref<2x32xi32, #tpu.memory_space<smem>>
    %c0_143 = arith.constant 0 : index
    %276 = arith.index_cast %275 : i32 to index
    %c0_144 = arith.constant 0 : index
    %277 = vector.load %arg2[%c0_143, %276, %c0_144] : memref<1x16x1xf32, #tpu.memory_space<vmem>>, vector<1x1x1xf32>
    %278 = vector.shape_cast %277 : vector<1x1x1xf32> to vector<1x1xf32>
    %279 = vector.broadcast %278 : vector<1x1xf32> to vector<1x16xf32>
    %280 = arith.mulf %279, %243 : vector<1x16xf32>
    %c0_145 = arith.constant 0 : index
    %c27_146 = arith.constant 27 : index
    %c0_147 = arith.constant 0 : index
    %281 = vector.load %arg4[%c0_145, %c27_146, %c0_147] : memref<1x32x16xf32, #tpu.memory_space<vmem>>, vector<1x1x16xf32>
    %282 = vector.shape_cast %281 : vector<1x1x16xf32> to vector<1x16xf32>
    %283 = vector.shape_cast %280 : vector<1x16xf32> to vector<1x1x16xf32>
    tpu.vector_store %arg4[%c0_145, %c27_146, %c0_147], %283 {strides = array<i32>} : memref<1x32x16xf32, #tpu.memory_space<vmem>>, vector<1x1x16xf32>,
    %284 = arith.index_cast %arg0 : i32 to index
    %c28 = arith.constant 28 : index
    %285 = memref.load %arg1[%284, %c28] : memref<2x32xi32, #tpu.memory_space<smem>>
    %c0_148 = arith.constant 0 : index
    %286 = arith.index_cast %285 : i32 to index
    %c0_149 = arith.constant 0 : index
    %287 = vector.load %arg2[%c0_148, %286, %c0_149] : memref<1x16x1xf32, #tpu.memory_space<vmem>>, vector<1x1x1xf32>
    %288 = vector.shape_cast %287 : vector<1x1x1xf32> to vector<1x1xf32>
    %289 = vector.broadcast %288 : vector<1x1xf32> to vector<1x16xf32>
    %290 = arith.mulf %289, %243 : vector<1x16xf32>
    %c0_150 = arith.constant 0 : index
    %c28_151 = arith.constant 28 : index
    %c0_152 = arith.constant 0 : index
    %291 = vector.load %arg4[%c0_150, %c28_151, %c0_152] : memref<1x32x16xf32, #tpu.memory_space<vmem>>, vector<1x1x16xf32>
    %292 = vector.shape_cast %291 : vector<1x1x16xf32> to vector<1x16xf32>
    %293 = vector.shape_cast %290 : vector<1x16xf32> to vector<1x1x16xf32>
    tpu.vector_store %arg4[%c0_150, %c28_151, %c0_152], %293 {strides = array<i32>} : memref<1x32x16xf32, #tpu.memory_space<vmem>>, vector<1x1x16xf32>,
    %294 = arith.index_cast %arg0 : i32 to index
    %c29 = arith.constant 29 : index
    %295 = memref.load %arg1[%294, %c29] : memref<2x32xi32, #tpu.memory_space<smem>>
    %c0_153 = arith.constant 0 : index
    %296 = arith.index_cast %295 : i32 to index
    %c0_154 = arith.constant 0 : index
    %297 = vector.load %arg2[%c0_153, %296, %c0_154] : memref<1x16x1xf32, #tpu.memory_space<vmem>>, vector<1x1x1xf32>
    %298 = vector.shape_cast %297 : vector<1x1x1xf32> to vector<1x1xf32>
    %299 = vector.broadcast %298 : vector<1x1xf32> to vector<1x16xf32>
    %300 = arith.mulf %299, %243 : vector<1x16xf32>
    %c0_155 = arith.constant 0 : index
    %c29_156 = arith.constant 29 : index
    %c0_157 = arith.constant 0 : index
    %301 = vector.load %arg4[%c0_155, %c29_156, %c0_157] : memref<1x32x16xf32, #tpu.memory_space<vmem>>, vector<1x1x16xf32>
    %302 = vector.shape_cast %301 : vector<1x1x16xf32> to vector<1x16xf32>
    %303 = vector.shape_cast %300 : vector<1x16xf32> to vector<1x1x16xf32>
    tpu.vector_store %arg4[%c0_155, %c29_156, %c0_157], %303 {strides = array<i32>} : memref<1x32x16xf32, #tpu.memory_space<vmem>>, vector<1x1x16xf32>,
    %304 = arith.index_cast %arg0 : i32 to index
    %c30 = arith.constant 30 : index
    %305 = memref.load %arg1[%304, %c30] : memref<2x32xi32, #tpu.memory_space<smem>>
    %c0_158 = arith.constant 0 : index
    %306 = arith.index_cast %305 : i32 to index
    %c0_159 = arith.constant 0 : index
    %307 = vector.load %arg2[%c0_158, %306, %c0_159] : memref<1x16x1xf32, #tpu.memory_space<vmem>>, vector<1x1x1xf32>
    %308 = vector.shape_cast %307 : vector<1x1x1xf32> to vector<1x1xf32>
    %309 = vector.broadcast %308 : vector<1x1xf32> to vector<1x16xf32>
    %310 = arith.mulf %309, %243 : vector<1x16xf32>
    %c0_160 = arith.constant 0 : index
    %c30_161 = arith.constant 30 : index
    %c0_162 = arith.constant 0 : index
    %311 = vector.load %arg4[%c0_160, %c30_161, %c0_162] : memref<1x32x16xf32, #tpu.memory_space<vmem>>, vector<1x1x16xf32>
    %312 = vector.shape_cast %311 : vector<1x1x16xf32> to vector<1x16xf32>
    %313 = vector.shape_cast %310 : vector<1x16xf32> to vector<1x1x16xf32>
    tpu.vector_store %arg4[%c0_160, %c30_161, %c0_162], %313 {strides = array<i32>} : memref<1x32x16xf32, #tpu.memory_space<vmem>>, vector<1x1x16xf32>,
    %314 = arith.index_cast %arg0 : i32 to index
    %c31 = arith.constant 31 : index
    %315 = memref.load %arg1[%314, %c31] : memref<2x32xi32, #tpu.memory_space<smem>>
    %c0_163 = arith.constant 0 : index
    %316 = arith.index_cast %315 : i32 to index
    %c0_164 = arith.constant 0 : index
    %317 = vector.load %arg2[%c0_163, %316, %c0_164] : memref<1x16x1xf32, #tpu.memory_space<vmem>>, vector<1x1x1xf32>
    %318 = vector.shape_cast %317 : vector<1x1x1xf32> to vector<1x1xf32>
    %319 = vector.broadcast %318 : vector<1x1xf32> to vector<1x16xf32>
    %320 = arith.mulf %319, %243 : vector<1x16xf32>
    %c0_165 = arith.constant 0 : index
    %c31_166 = arith.constant 31 : index
    %c0_167 = arith.constant 0 : index
    %321 = vector.load %arg4[%c0_165, %c31_166, %c0_167] : memref<1x32x16xf32, #tpu.memory_space<vmem>>, vector<1x1x16xf32>
    %322 = vector.shape_cast %321 : vector<1x1x16xf32> to vector<1x16xf32>
    %323 = vector.shape_cast %320 : vector<1x16xf32> to vector<1x1x16xf32>
    tpu.vector_store %arg4[%c0_165, %c31_166, %c0_167], %323 {strides = array<i32>} : memref<1x32x16xf32, #tpu.memory_space<vmem>>, vector<1x1x16xf32>,
    return
  }
  func.func @transform_0(%arg0: i32, %arg1: memref<2x32xi32, #tpu.memory_space<smem>>) -> (i32, i32, i32) {
    %c0_i32 = arith.constant 0 : i32
    %c0_i32_0 = arith.constant 0 : i32
    %c0_i32_1 = arith.constant 0 : i32
    return %arg0, %c0_i32, %c0_i32_0 : i32, i32, i32
  }
  func.func @transform_1(%arg0: i32, %arg1: memref<2x32xi32, #tpu.memory_space<smem>>) -> (i32, i32) {
    %c0_i32 = arith.constant 0 : i32
    %c0_i32_0 = arith.constant 0 : i32
    %c0_i32_1 = arith.constant 0 : i32
    return %c0_i32, %c0_i32_0 : i32, i32
  }
  func.func @transform_2(%arg0: i32, %arg1: memref<2x32xi32, #tpu.memory_space<smem>>) -> (i32, i32, i32) {
    %c0_i32 = arith.constant 0 : i32
    %c0_i32_0 = arith.constant 0 : i32
    %c0_i32_1 = arith.constant 0 : i32
    return %arg0, %c0_i32, %c0_i32_0 : i32, i32, i32
  }
}

</mosaic_0001>

<bundles_post_ra>
// kernel: tpu_custom_call.1
= control target key start
LH: loop header
LB: loop body
LE: loop exit
PB: predicated region body
PF: predicated region fallthrough
CT: control target
= control target key end

     0   :  { %s835_s0 = inlined_call_operand.vmem [shape: s32[2,32], index: 0, kind: input, shape index: {}]   ;;  %s836_s1 = inlined_call_operand.vmem [shape: f32[2,16,1], index: 1, kind: input, shape index: {}]   ;;  %s837_s2 = inlined_call_operand.vmem [shape: f32[4,16], index: 2, kind: input, shape index: {}]   ;;  %s838_s3 = inlined_call_operand.vmem [shape: f32[2,32,16], index: 3, kind: output, shape index: {}]  }
   0x1   :  { %s8_s14 = sshll.u32 %s835_s0, 4  ;;  %s9_s14 = int_to_ptr.vmem [resolvable:$true] %s8_s14 }
   0x2   :  { %s621_s15 = scalar_lea.vmem %s9_s14, 32  ;;  %p626_p1 = scmp.lt.s32.totalorder %s9_s14, %s9_s14 }
   0x3   :  { %p622_p0 = scmp.ne.s32.totalorder %s9_s14, %s621_s15  ;;  %p627_p2 = scmp.lt.s32.totalorder %s621_s15, %s621_s15 }
   0x5   :  { %p628_p3 = por %p627_p2, %p626_p1 }
   0x7   :  { %p629_p4 = pnand %p628_p3, %p622_p0 }
   0x9   :  { %632 = shalt.err (!%p629_p4)  }
   0xa   :  { %s643_s16 = smov [#allocation3]  }
   0xb   :  { %11 = dma.vmem_to_smem %s9_s14, 32, %s643_s16, [#allocation2] }
   0xc   :  { %637 = dma.done.wait [#allocation2], 32 }
   0xd   :  { %638 = vsyncadd [#allocation2], 4294967264 }
   0xe   :  { %13 = sfence }
   0xf   :  { %s668_s17 = smov 0  }
  0x10 LB: > { %s595_s0 = sadd.s32 4294967295, %s641_s17   ;;  %p599_p5 = scmp.ge.s32.totalorder %s641_s17, 1  ;;  %s641_s17 = sphi %s668_s17, %s19_s17  }
  0x11   : > { %p119_p6 = scmp.lt.s32.totalorder %s641_s17, 3 }
  0x13   : > { %p120_p7 = pnand %p599_p5, %p119_p6 }
  0x14   : > { %p141_p8 = scmp.lt.s32.totalorder (!%p120_p7), %s595_s0, 1  ;;  %s676_s18 = sshll.u32 (!%p120_p7), %s595_s0, 7  ;;  %v644_v0 = vmov (!%p120_p7), 0   ;;  %v151_v33 = vld [vmem:[%s837_s2] sm:$0x1] (!%p120_p7)  ;;  %vm162_vm0 = vcmask (!%p120_p7), 122880  }
  0x15   : > { %123 = sbr.rel (%p120_p7) target bundleno = 225 (0xe1), region = 28  ;;  %619 = vset.pattern.permute.xlu0 (!%p120_p7), %v644_v0  ;;  %620 = vset.pattern.permute.xlu1 (!%p120_p7), %v644_v0  ;;  %s153_s19 = sld [smem:[#allocation3 + %s676_s18]] (!%p120_p7)  ;;  %v241_v49 = vld [vmem:[%s837_s2 + $0x1] sm:$0x1] (!%p120_p7) }
  0x16   : > { %s175_s20 = sadd.s32 (!%p120_p7), 2, %s676_s18  ;;  %s164_s22 = sadd.s32 (!%p120_p7), 1, %s676_s18 }
  0x17   : > { %s176_s21 = sld [smem:[#allocation3 + %s175_s20]] (!%p120_p7)  ;;  %s186_s28 = sadd.s32 (!%p120_p7), 3, %s676_s18 }
  0x18   : > { %s165_s24 = sld [smem:[#allocation3 + %s164_s22]] (!%p120_p7)  ;;  %s197_s30 = sadd.s32 (!%p120_p7), 4, %s676_s18 }
  0x19   : > { %s187_s29 = sld [smem:[#allocation3 + %s186_s28]] (!%p120_p7)  ;;  %s208_s6 = sadd.s32 (!%p120_p7), 5, %s676_s18 }
  0x1a   : > { %s198_s5 = sld [smem:[#allocation3 + %s197_s30]] (!%p120_p7)  ;;  %s219_s7 = sadd.s32 (!%p120_p7), 6, %s676_s18 }
  0x1b   : > { %s209_s9 = sld [smem:[#allocation3 + %s208_s6]] (!%p120_p7)  ;;  %s230_s12 = sadd.s32 (!%p120_p7), 7, %s676_s18 }
  0x1c   : > { %s840_s0 = smov (!%p141_p8, %s595_s0), 1  ;;  %s220_s11 = sld [smem:[#allocation3 + %s219_s7]] }
  0x1d   : > { %s607_s23 = sshll.u32 %s840_s0, 4  ;;  %s242_s13 = sadd.s32 8, %s676_s18 }
  0x1e   : > { %s687_s27 = scalar_lea.vmem %s836_s1, %s607_s23  ;;  %s231_s15 = sld [smem:[#allocation3 + %s230_s12]] }
  0x1f   : > { %s154_s4 = scalar_lea.vmem %s687_s27, %s153_s19  ;;  %s177_s8 = scalar_lea.vmem %s687_s27, %s176_s21 }
  0x20   : > { %v155_v1 = vld [vmem:[%s154_s4] sm:$0x1]  ;;  %s166_s10 = scalar_lea.vmem %s687_s27, %s165_s24  ;;  %s188_s14 = scalar_lea.vmem %s687_s27, %s187_s29 }
  0x21   : > { %158 = vperm.xlu0 %619, %v155_v1   ;;  %v178_v2 = vld [vmem:[%s177_s8] sm:$0x1]  ;;  %s199_s16 = scalar_lea.vmem %s687_s27, %s198_s5  ;;  %s243_s19 = sld [smem:[#allocation3 + %s242_s13]] }
  0x22   : > { %181 = vperm.xlu1 %620, %v178_v2   ;;  %v167_v3 = vld [vmem:[%s166_s10] sm:$0x1]  ;;  %s253_s20 = sadd.s32 9, %s676_s18  ;;  %s264_s21 = sadd.s32 10, %s676_s18  ;;  %v330_v2 = vld [vmem:[%s837_s2 + $0x2] sm:$0x1] }
  0x23   : > { %v189_v4 = vld [vmem:[%s188_s14] sm:$0x1]  ;;  %s210_s22 = scalar_lea.vmem %s687_s27, %s209_s9  ;;  %s254_s23 = sld [smem:[#allocation3 + %s253_s20]] }
  0x24   : > { %v200_v5 = vld [vmem:[%s199_s16] sm:$0x1]  ;;  %s221_s24 = scalar_lea.vmem %s687_s27, %s220_s11  ;;  %s265_s25 = sld [smem:[#allocation3 + %s264_s21]] }
  0x25   : > { %170 = vperm.xlu0 %619, %v167_v3   ;;  %v211_v6 = vld [vmem:[%s210_s22] sm:$0x1]  ;;  %s275_s26 = sadd.s32 11, %s676_s18  ;;  %s286_s28 = sadd.s32 12, %s676_s18 }
  0x26   : > { %192 = vperm.xlu1 %620, %v189_v4   ;;  %v222_v7 = vld [vmem:[%s221_s24] sm:$0x1]  ;;  %s232_s29 = scalar_lea.vmem %s687_s27, %s231_s15  ;;  %s276_s30 = sld [smem:[#allocation3 + %s275_s26]] }
  0x27   : > { %s244_s4 = scalar_lea.vmem %s687_s27, %s243_s19  ;;  %s287_s5 = sld [smem:[#allocation3 + %s286_s28]]  ;;  %v233_v8 = vld [vmem:[%s232_s29] sm:$0x1] }
  0x28   : > { %s297_s6 = sadd.s32 13, %s676_s18  ;;  %s308_s7 = sadd.s32 14, %s676_s18  ;;  %v245_v9 = vld [vmem:[%s244_s4] sm:$0x1] }
  0x29   : > { %203 = vperm.xlu0 %619, %v200_v5   ;;  %s255_s8 = scalar_lea.vmem %s687_s27, %s254_s23  ;;  %s298_s9 = sld [smem:[#allocation3 + %s297_s6]] }
  0x2a   : > { %214 = vperm.xlu1 %620, %v211_v6   ;;  %s266_s10 = scalar_lea.vmem %s687_s27, %s265_s25  ;;  %s309_s11 = sld [smem:[#allocation3 + %s308_s7]]  ;;  %v256_v10 = vld [vmem:[%s255_s8] sm:$0x1] }
  0x2b   : > { %s319_s12 = sadd.s32 15, %s676_s18  ;;  %s331_s13 = sadd.s32 16, %s676_s18  ;;  %v267_v11 = vld [vmem:[%s266_s10] sm:$0x1] }
  0x2c   : > { %s277_s14 = scalar_lea.vmem %s687_s27, %s276_s30  ;;  %s320_s15 = sld [smem:[#allocation3 + %s319_s12]] }
  0x2d   : > { %225 = vperm.xlu0 %619, %v222_v7   ;;  %s342_s16 = sadd.s32 17, %s676_s18  ;;  %s288_s19 = scalar_lea.vmem %s687_s27, %s287_s5  ;;  %v278_v12 = vld [vmem:[%s277_s14] sm:$0x1] }
  0x2e   : > { %236 = vperm.xlu1 %620, %v233_v8   ;;  %s332_s20 = sld [smem:[#allocation3 + %s331_s13]]  ;;  %s353_s21 = sadd.s32 18, %s676_s18  ;;  %v289_v13 = vld [vmem:[%s288_s19] sm:$0x1] }
  0x2f   : > { %s299_s22 = scalar_lea.vmem %s687_s27, %s298_s9  ;;  %s343_s23 = sld [smem:[#allocation3 + %s342_s16]] }
  0x30   : > { %s364_s24 = sadd.s32 19, %s676_s18  ;;  %s310_s25 = scalar_lea.vmem %s687_s27, %s309_s11  ;;  %v300_v14 = vld [vmem:[%s299_s22] sm:$0x1] }
  0x31   : > { %248 = vperm.xlu0 %619, %v245_v9   ;;  %s354_s26 = sld [smem:[#allocation3 + %s353_s21]]  ;;  %s375_s28 = sadd.s32 20, %s676_s18  ;;  %v311_v15 = vld [vmem:[%s310_s25] sm:$0x1] }
  0x32   : > { %259 = vperm.xlu1 %620, %v256_v10   ;;  %s321_s29 = scalar_lea.vmem %s687_s27, %s320_s15  ;;  %s365_s30 = sld [smem:[#allocation3 + %s364_s24]] }
  0x33   : > { %s386_s4 = sadd.s32 21, %s676_s18  ;;  %s376_s6 = sld [smem:[#allocation3 + %s375_s28]]  ;;  %v322_v16 = vld [vmem:[%s321_s29] sm:$0x1] }
  0x34   : > { %s333_s5 = scalar_lea.vmem %s687_s27, %s332_s20  ;;  %s397_s7 = sadd.s32 22, %s676_s18 }
  0x35   : > { %270 = vperm.xlu0 %619, %v267_v11   ;;  %s344_s8 = scalar_lea.vmem %s687_s27, %s343_s23  ;;  %s387_s9 = sld [smem:[#allocation3 + %s386_s4]]  ;;  %v334_v17 = vld [vmem:[%s333_s5] sm:$0x1] }
  0x36   : > { %281 = vperm.xlu1 %620, %v278_v12   ;;  %s408_s10 = sadd.s32 23, %s676_s18  ;;  %s398_s12 = sld [smem:[#allocation3 + %s397_s7]]  ;;  %v345_v18 = vld [vmem:[%s344_s8] sm:$0x1] }
  0x37   : > { %s355_s11 = scalar_lea.vmem %s687_s27, %s354_s26  ;;  %s420_s13 = sadd.s32 24, %s676_s18 }
  0x38   : > { %s366_s14 = scalar_lea.vmem %s687_s27, %s365_s30  ;;  %s409_s15 = sld [smem:[#allocation3 + %s408_s10]]  ;;  %v356_v19 = vld [vmem:[%s355_s11] sm:$0x1] }
  0x39   : > { %292 = vperm.xlu0 %619, %v289_v13   ;;  %s431_s16 = sadd.s32 25, %s676_s18  ;;  %s377_s19 = scalar_lea.vmem %s687_s27, %s376_s6  ;;  %v367_v20 = vld [vmem:[%s366_s14] sm:$0x1] }
  0x3a   : > { %303 = vperm.xlu1 %620, %v300_v14   ;;  %s421_s20 = sld [smem:[#allocation3 + %s420_s13]]  ;;  %s442_s21 = sadd.s32 26, %s676_s18  ;;  %v378_v21 = vld [vmem:[%s377_s19] sm:$0x1] }
  0x3b   : > { %s388_s22 = scalar_lea.vmem %s687_s27, %s387_s9  ;;  %s432_s23 = sld [smem:[#allocation3 + %s431_s16]] }
  0x3c   : > { %s453_s24 = sadd.s32 27, %s676_s18  ;;  %s399_s25 = scalar_lea.vmem %s687_s27, %s398_s12  ;;  %v389_v22 = vld [vmem:[%s388_s22] sm:$0x1] }
  0x3d   : > { %314 = vperm.xlu0 %619, %v311_v15   ;;  %s443_s26 = sld [smem:[#allocation3 + %s442_s21]]  ;;  %s464_s28 = sadd.s32 28, %s676_s18  ;;  %v400_v23 = vld [vmem:[%s399_s25] sm:$0x1] }
  0x3e   : > { %325 = vperm.xlu1 %620, %v322_v16   ;;  %s410_s29 = scalar_lea.vmem %s687_s27, %s409_s15  ;;  %s454_s30 = sld [smem:[#allocation3 + %s453_s24]] }
  0x3f   : > { %s475_s4 = sadd.s32 29, %s676_s18  ;;  %s465_s6 = sld [smem:[#allocation3 + %s464_s28]]  ;;  %v411_v24 = vld [vmem:[%s410_s29] sm:$0x1] }
  0x40   : > { %s422_s5 = scalar_lea.vmem %s687_s27, %s421_s20  ;;  %s486_s7 = sadd.s32 30, %s676_s18 }
  0x41   : > { %337 = vperm.xlu0 %619, %v334_v17   ;;  %s433_s8 = scalar_lea.vmem %s687_s27, %s432_s23  ;;  %s476_s9 = sld [smem:[#allocation3 + %s475_s4]]  ;;  %v423_v25 = vld [vmem:[%s422_s5] sm:$0x1] }
  0x42   : > { %348 = vperm.xlu1 %620, %v345_v18   ;;  %s497_s10 = sadd.s32 31, %s676_s18  ;;  %s487_s12 = sld [smem:[#allocation3 + %s486_s7]]  ;;  %v434_v26 = vld [vmem:[%s433_s8] sm:$0x1] }
  0x43   : > { %s444_s11 = scalar_lea.vmem %s687_s27, %s443_s26  ;;  %s498_s14 = sld [smem:[#allocation3 + %s497_s10]] }
  0x44   : > { %s455_s13 = scalar_lea.vmem %s687_s27, %s454_s30  ;;  %v445_v27 = vld [vmem:[%s444_s11] sm:$0x1]  ;;  %s608_s20 = sshll.u32 %s840_s0, 5 }
  0x45   : > { %359 = vperm.xlu0 %619, %v356_v19   ;;  %s466_s15 = scalar_lea.vmem %s687_s27, %s465_s6  ;;  %v456_v28 = vld [vmem:[%s455_s13] sm:$0x1]  ;;  %s757_s25 = scalar_lea.vmem %s838_s3, %s608_s20  ;;  %v419_v19 = vld [vmem:[%s837_s2 + $0x3] sm:$0x1] }
  0x46   : > { %370 = vperm.xlu1 %620, %v367_v20   ;;  %v467_v29 = vld [vmem:[%s466_s15] sm:$0x1] }
  0x47   : > { %s477_s16 = scalar_lea.vmem %s687_s27, %s476_s9 }
  0x48   : > { %s488_s19 = scalar_lea.vmem %s687_s27, %s487_s12  ;;  %v478_v30 = vld [vmem:[%s477_s16] sm:$0x1] }
  0x49   : > { %381 = vperm.xlu0 %619, %v378_v21   ;;  %s499_s18 = scalar_lea.vmem %s687_s27, %s498_s14  ;;  %v489_v31 = vld [vmem:[%s488_s19] sm:$0x1] }
  0x4a   : > { %392 = vperm.xlu1 %620, %v389_v22   ;;  %v500_v32 = vld [vmem:[%s499_s18] sm:$0x1] }
  0x4d   : > { %403 = vperm.xlu0 %619, %v400_v23  }
  0x4e   : > { %414 = vperm.xlu1 %620, %v411_v24  }
  0x51   : > { %426 = vperm.xlu0 %619, %v423_v25  }
  0x52   : > { %437 = vperm.xlu1 %620, %v434_v26  }
  0x55   : > { %448 = vperm.xlu0 %619, %v445_v27  }
  0x56   : > { %459 = vperm.xlu1 %620, %v456_v28  }
  0x59   : > { %470 = vperm.xlu0 %619, %v467_v29  }
  0x5a   : > { %481 = vperm.xlu1 %620, %v478_v30  }
  0x5d   : > { %492 = vperm.xlu0 %619, %v489_v31  }
  0x5e   : > { %503 = vperm.xlu1 %620, %v500_v32  }
  0xa0   : > { %v159_v34 = vpop.permute.xlu0 %158 }
  0xa1   : > { %v161_v35 = vmul.f32 %v159_v34, %v151_v33  ;;  %v182_v36 = vpop.permute.xlu1 %181 }
  0xa2   : > { %v184_v37 = vmul.f32 %v182_v36, %v151_v33 }
  0xa3   : > { %163 = vst.msk [vmem:[%s757_s25] sm:$0x1] %vm162_vm0, %v161_v35 }
  0xa4   : > { %v171_v38 = vpop.permute.xlu0 %170  ;;  %185 = vst.msk [vmem:[%s757_s25 + $0x2] sm:$0x1] %vm162_vm0, %v184_v37 }
  0xa5   : > { %v173_v39 = vmul.f32 %v171_v38, %v151_v33  ;;  %v193_v40 = vpop.permute.xlu1 %192 }
  0xa6   : > { %v195_v41 = vmul.f32 %v193_v40, %v151_v33 }
  0xa7   : > { %174 = vst.msk [vmem:[%s757_s25 + $0x1] sm:$0x1] %vm162_vm0, %v173_v39 }
  0xa8   : > { %v204_v42 = vpop.permute.xlu0 %203  ;;  %196 = vst.msk [vmem:[%s757_s25 + $0x3] sm:$0x1] %vm162_vm0, %v195_v41 }
  0xa9   : > { %v206_v43 = vmul.f32 %v204_v42, %v151_v33  ;;  %v215_v44 = vpop.permute.xlu1 %214 }
  0xaa   : > { %v217_v45 = vmul.f32 %v215_v44, %v151_v33 }
  0xab   : > { %207 = vst.msk [vmem:[%s757_s25 + $0x4] sm:$0x1] %vm162_vm0, %v206_v43 }
  0xac   : > { %v226_v46 = vpop.permute.xlu0 %225  ;;  %218 = vst.msk [vmem:[%s757_s25 + $0x5] sm:$0x1] %vm162_vm0, %v217_v45 }
  0xad   : > { %v228_v47 = vmul.f32 %v226_v46, %v151_v33  ;;  %v237_v48 = vpop.permute.xlu1 %236 }
  0xae   : > { %v239_v50 = vmul.f32 %v237_v48, %v151_v33 }
  0xaf   : > { %229 = vst.msk [vmem:[%s757_s25 + $0x6] sm:$0x1] %vm162_vm0, %v228_v47 }
  0xb0   : > { %v249_v51 = vpop.permute.xlu0 %248  ;;  %240 = vst.msk [vmem:[%s757_s25 + $0x7] sm:$0x1] %vm162_vm0, %v239_v50 }
  0xb1   : > { %v251_v52 = vmul.f32 %v249_v51, %v241_v49  ;;  %v260_v53 = vpop.permute.xlu1 %259 }
  0xb2   : > { %v262_v54 = vmul.f32 %v260_v53, %v241_v49 }
  0xb3   : > { %252 = vst.msk [vmem:[%s757_s25 + $0x8] sm:$0x1] %vm162_vm0, %v251_v52 }
  0xb4   : > { %v271_v55 = vpop.permute.xlu0 %270  ;;  %263 = vst.msk [vmem:[%s757_s25 + $0x9] sm:$0x1] %vm162_vm0, %v262_v54 }
  0xb5   : > { %v273_v56 = vmul.f32 %v271_v55, %v241_v49  ;;  %v282_v57 = vpop.permute.xlu1 %281 }
  0xb6   : > { %v284_v58 = vmul.f32 %v282_v57, %v241_v49 }
  0xb7   : > { %274 = vst.msk [vmem:[%s757_s25 + $0xa] sm:$0x1] %vm162_vm0, %v273_v56 }
  0xb8   : > { %v293_v59 = vpop.permute.xlu0 %292  ;;  %285 = vst.msk [vmem:[%s757_s25 + $0xb] sm:$0x1] %vm162_vm0, %v284_v58 }
  0xb9   : > { %v295_v60 = vmul.f32 %v293_v59, %v241_v49  ;;  %v304_v61 = vpop.permute.xlu1 %303 }
  0xba   : > { %v306_v62 = vmul.f32 %v304_v61, %v241_v49 }
  0xbb   : > { %296 = vst.msk [vmem:[%s757_s25 + $0xc] sm:$0x1] %vm162_vm0, %v295_v60 }
  0xbc   : > { %v315_v63 = vpop.permute.xlu0 %314  ;;  %307 = vst.msk [vmem:[%s757_s25 + $0xd] sm:$0x1] %vm162_vm0, %v306_v62 }
  0xbd   : > { %v317_v0 = vmul.f32 %v315_v63, %v241_v49  ;;  %v326_v1 = vpop.permute.xlu1 %325 }
  0xbe   : > { %v328_v3 = vmul.f32 %v326_v1, %v241_v49 }
  0xbf   : > { %318 = vst.msk [vmem:[%s757_s25 + $0xe] sm:$0x1] %vm162_vm0, %v317_v0 }
  0xc0   : > { %v338_v4 = vpop.permute.xlu0 %337  ;;  %329 = vst.msk [vmem:[%s757_s25 + $0xf] sm:$0x1] %vm162_vm0, %v328_v3 }
  0xc1   : > { %v340_v5 = vmul.f32 %v338_v4, %v330_v2  ;;  %v349_v6 = vpop.permute.xlu1 %348 }
  0xc2   : > { %v351_v7 = vmul.f32 %v349_v6, %v330_v2 }
  0xc3   : > { %341 = vst.msk [vmem:[%s757_s25 + $0x10] sm:$0x1] %vm162_vm0, %v340_v5 }
  0xc4   : > { %v360_v8 = vpop.permute.xlu0 %359  ;;  %352 = vst.msk [vmem:[%s757_s25 + $0x11] sm:$0x1] %vm162_vm0, %v351_v7 }
  0xc5   : > { %v362_v9 = vmul.f32 %v360_v8, %v330_v2  ;;  %v371_v10 = vpop.permute.xlu1 %370 }
  0xc6   : > { %v373_v11 = vmul.f32 %v371_v10, %v330_v2 }
  0xc7   : > { %363 = vst.msk [vmem:[%s757_s25 + $0x12] sm:$0x1] %vm162_vm0, %v362_v9 }
  0xc8   : > { %v382_v12 = vpop.permute.xlu0 %381  ;;  %374 = vst.msk [vmem:[%s757_s25 + $0x13] sm:$0x1] %vm162_vm0, %v373_v11 }
  0xc9   : > { %v384_v13 = vmul.f32 %v382_v12, %v330_v2  ;;  %v393_v14 = vpop.permute.xlu1 %392 }
  0xca   : > { %v395_v15 = vmul.f32 %v393_v14, %v330_v2 }
  0xcb   : > { %385 = vst.msk [vmem:[%s757_s25 + $0x14] sm:$0x1] %vm162_vm0, %v384_v13 }
  0xcc   : > { %v404_v16 = vpop.permute.xlu0 %403  ;;  %396 = vst.msk [vmem:[%s757_s25 + $0x15] sm:$0x1] %vm162_vm0, %v395_v15 }
  0xcd   : > { %v406_v17 = vmul.f32 %v404_v16, %v330_v2  ;;  %v415_v18 = vpop.permute.xlu1 %414 }
  0xce   : > { %v417_v20 = vmul.f32 %v415_v18, %v330_v2 }
  0xcf   : > { %407 = vst.msk [vmem:[%s757_s25 + $0x16] sm:$0x1] %vm162_vm0, %v406_v17 }
  0xd0   : > { %v427_v21 = vpop.permute.xlu0 %426  ;;  %418 = vst.msk [vmem:[%s757_s25 + $0x17] sm:$0x1] %vm162_vm0, %v417_v20 }
  0xd1   : > { %v429_v22 = vmul.f32 %v427_v21, %v419_v19  ;;  %v438_v23 = vpop.permute.xlu1 %437 }
  0xd2   : > { %v440_v24 = vmul.f32 %v438_v23, %v419_v19 }
  0xd3   : > { %430 = vst.msk [vmem:[%s757_s25 + $0x18] sm:$0x1] %vm162_vm0, %v429_v22 }
  0xd4   : > { %v449_v25 = vpop.permute.xlu0 %448  ;;  %441 = vst.msk [vmem:[%s757_s25 + $0x19] sm:$0x1] %vm162_vm0, %v440_v24 }
  0xd5   : > { %v451_v26 = vmul.f32 %v449_v25, %v419_v19  ;;  %v460_v27 = vpop.permute.xlu1 %459 }
  0xd6   : > { %v462_v28 = vmul.f32 %v460_v27, %v419_v19 }
  0xd7   : > { %452 = vst.msk [vmem:[%s757_s25 + $0x1a] sm:$0x1] %vm162_vm0, %v451_v26 }
  0xd8   : > { %v471_v29 = vpop.permute.xlu0 %470  ;;  %463 = vst.msk [vmem:[%s757_s25 + $0x1b] sm:$0x1] %vm162_vm0, %v462_v28 }
  0xd9   : > { %v473_v30 = vmul.f32 %v471_v29, %v419_v19  ;;  %v482_v31 = vpop.permute.xlu1 %481 }
  0xda   : > { %v484_v32 = vmul.f32 %v482_v31, %v419_v19 }
  0xdb   : > { %474 = vst.msk [vmem:[%s757_s25 + $0x1c] sm:$0x1] %vm162_vm0, %v473_v30 }
  0xdc   : > { %v493_v33 = vpop.permute.xlu0 %492  ;;  %485 = vst.msk [vmem:[%s757_s25 + $0x1d] sm:$0x1] %vm162_vm0, %v484_v32 }
  0xdd   : > { %v495_v34 = vmul.f32 %v493_v33, %v419_v19  ;;  %v504_v35 = vpop.permute.xlu1 %503 }
  0xde   : > { %v506_v36 = vmul.f32 %v504_v35, %v419_v19 }
  0xdf   : > { %496 = vst.msk [vmem:[%s757_s25 + $0x1e] sm:$0x1] %vm162_vm0, %v495_v34 }
  0xe0   : > { %507 = vst.msk [vmem:[%s757_s25 + $0x1f] sm:$0x1] %vm162_vm0, %v506_v36 }
  0xe1 PF: > { %s19_s17 = sadd.s32 1, %s641_s17  }
  0xe2   : > { %p16_p9 = scmp.ge.s32.totalorder %s19_s17, 4  }
  0xe4   :  { %18 = sbr.rel (!%p16_p9) target bundleno = 16 (0x10), region = 90 }

</bundles_post_ra>
